<compile_context>
chip_gen: v7x
topology: tpu7x:2x2x1
jax: 0.10.0
libtpu: 0.0.40
codegen_flags: <defaults>
</compile_context>

<pallas_src>
import jax
import jax.numpy as jnp
from jax.experimental import pallas as pl
from jax.experimental.pallas import tpu as pltpu


def _round_up(n: int, m: int) -> int:
    return ((n + m - 1) // m) * m


def mlp_kernel(w1_ref, b1_ref, w2_ref, b2_ref, x_ref, o_ref):
    """Pure-VPU fused MLP on dense (rows, 128) feature planes.

    w1_ref: (2, 5) f32 SMEM     b1_ref: (5,) f32 SMEM
    w2_ref: (5, 3) f32 SMEM     b2_ref: (3,) f32 SMEM
    x_ref : (2, TR, 128) f32 VMEM    o_ref: (3, TR, 128) f32 VMEM
    """
    # Read all 33 scalars once (one sld + one broadcast per constant per block).
    w1 = [[w1_ref[k, j] for j in range(5)] for k in range(2)]
    b1 = [b1_ref[j] for j in range(5)]
    w2 = [[w2_ref[k, i] for i in range(3)] for k in range(5)]
    b2 = [b2_ref[i] for i in range(3)]

    x0 = x_ref[0]                      # (TR, 128) dense slab
    x1 = x_ref[1]                      # (TR, 128) dense slab

    # Layer 1: h[j] = relu(w1[0,j]*x0 + w1[1,j]*x1 + b1[j])      (5 planes)
    h = []
    for j in range(5):
        hj = x0 * w1[0][j] + x1 * w1[1][j] + b1[j]
        h.append(jnp.maximum(hj, 0.0))

    # Layer 2: y[i] = relu(sum_k w2[k,i]*h[k] + b2[i])           (3 planes)
    # Direct per-plane dense stores (no concatenate / sublane repack).
    for i in range(3):
        acc = h[0] * w2[0][i]
        for k in range(1, 5):
            acc = acc + h[k] * w2[k][i]
        acc = acc + b2[i]
        o_ref[i] = jnp.maximum(acc, 0.0)


def net2_forward_planes(x_planes, w1, b1, w2, b2, *, block_rows=None):
    """Feature-major entry point (no wrapper transpose/pad HBM passes).

    x_planes: (2, R, 128) f32, R a multiple of 8 (or equal to block_rows).
    Returns (3, R, 128) f32.
    """
    _, R, L = x_planes.shape
    assert L == 128
    if block_rows is None:
        block_rows = min(1024, _round_up(R, 8))
    assert R % block_rows == 0, (R, block_rows)
    n_blocks = R // block_rows

    smem = pl.BlockSpec(memory_space=pltpu.MemorySpace.SMEM)

    return pl.pallas_call(
        mlp_kernel,
        out_shape=jax.ShapeDtypeStruct((3, R, 128), jnp.float32),
        grid=(n_blocks,),
        in_specs=[
            smem,                                                # w1 (2,5)
            smem,                                                # b1 (5,)
            smem,                                                # w2 (5,3)
            smem,                                                # b2 (3,)
            pl.BlockSpec((2, block_rows, 128), lambda i: (0, i, 0)),
        ],
        out_specs=pl.BlockSpec((3, block_rows, 128), lambda i: (0, i, 0)),
        compiler_params=pltpu.CompilerParams(
            dimension_semantics=("parallel",),       # megacore split on v7x
            vmem_limit_bytes=32 * 1024 * 1024,       # headroom for big blocks
        ),
    )(w1, b1, w2, b2, x_planes)


def net2_forward(x, w1, b1, w2, b2, *, max_block_rows: int = 1024):
    """PyTorch-layout wrapper.  x: (B, 2) f32 -> (B, 3) f32.

    Layout plumbing (transpose/pad/reshape) happens here, outside the kernel.
    Callers that care about end-to-end bandwidth at large B should use
    net2_forward_planes() with feature-major data directly.
    """
    B = x.shape[0]
    R = pl.cdiv(B, 128)                               # rows of 128 batch elems
    block_rows = min(max_block_rows, _round_up(R, 8))
    R_pad = _round_up(R, block_rows)
    n_padded_B = R_pad * 128

    xt = jnp.transpose(x.astype(jnp.float32))         # (2, B)
    xt = jnp.pad(xt, ((0, 0), (0, n_padded_B - B)))   # (2, B_pad)
    x_planes = xt.reshape(2, R_pad, 128)              # (2, R_pad, 128)

    out_planes = net2_forward_planes(
        x_planes, w1, b1, w2, b2, block_rows=block_rows)   # (3, R_pad, 128)

    out_t = out_planes.reshape(3, n_padded_B)
    # Padded columns computed relu(bias) garbage; sliced off here.
    return jnp.transpose(out_t[:, :B])                # (B, 3)


def init_params(key):
    """Deterministic init mimicking nn.Linear's uniform(-1/sqrt(fan_in), +)."""
    k1, k2, k3, k4 = jax.random.split(key, 4)
    lim1 = 1.0 / jnp.sqrt(2.0)
    lim2 = 1.0 / jnp.sqrt(5.0)
    # stored as (in_features, out_features) — transpose of PyTorch's layout
    w1 = jax.random.uniform(k1, (2, 5), jnp.float32, -lim1, lim1)
    b1 = jax.random.uniform(k2, (5,), jnp.float32, -lim1, lim1)
    w2 = jax.random.uniform(k3, (5, 3), jnp.float32, -lim2, lim2)
    b2 = jax.random.uniform(k4, (3,), jnp.float32, -lim2, lim2)
    return w1, b1, w2, b2


def net2_reference(x, w1, b1, w2, b2):
    h = jnp.maximum(x @ w1 + b1[None, :], 0.0)
    return jnp.maximum(h @ w2 + b2[None, :], 0.0)


if __name__ == "__main__":
    key = jax.random.PRNGKey(0)
    kx, kp, kx2 = jax.random.split(key, 3)
    w1, b1, w2, b2 = init_params(kp)

    # Primary small-shape check (matches the module's expected usage).
    B = 8
    x = jax.random.normal(kx, (B, 2), jnp.float32)
    out = jax.block_until_ready(net2_forward(x, w1, b1, w2, b2))
    ref = net2_reference(x, w1, b1, w2, b2)
    assert out.shape == (B, 3)
    assert jnp.allclose(out, ref, atol=1e-5, rtol=1e-5)

    # Secondary check: non-multiple-of-128 batch + multi-block grid + padding.
    B2 = 2500
    x2 = jax.random.normal(kx2, (B2, 2), jnp.float32)
    out2 = jax.block_until_ready(
        net2_forward(x2, w1, b1, w2, b2, max_block_rows=8))
    ref2 = net2_reference(x2, w1, b1, w2, b2)
    assert out2.shape == (B2, 3)
    assert jnp.allclose(out2, ref2, atol=1e-5, rtol=1e-5)

    print("KERNEL_OK")
</pallas_src>

<mosaic_0001>
module attributes {stable_mosaic.version = 11 : i64} {
  func.func @mlp_kernel(%arg0: i32, %arg1: memref<2x5xf32, #tpu.memory_space<smem>>, %arg2: memref<5xf32, #tpu.memory_space<smem>>, %arg3: memref<5x3xf32, #tpu.memory_space<smem>>, %arg4: memref<3xf32, #tpu.memory_space<smem>>, %arg5: memref<2x8x128xf32, #tpu.memory_space<vmem>>, %arg6: memref<3x8x128xf32, #tpu.memory_space<vmem>>) attributes {dimension_semantics = [#tpu.dimension_semantics<parallel>], iteration_bounds = array<i64: 1>, scalar_prefetch = 0 : i64, scratch_operands = 0 : i64, tpu.core_type = #tpu.core_type<tc>, window_params = [{transform_indices = @transform_0, window_bounds = array<i64: 2, 5>}, {transform_indices = @transform_1, window_bounds = array<i64: 5>}, {transform_indices = @transform_2, window_bounds = array<i64: 5, 3>}, {transform_indices = @transform_3, window_bounds = array<i64: 3>}, {transform_indices = @transform_4, window_bounds = array<i64: 2, 8, 128>}, {transform_indices = @transform_5, window_bounds = array<i64: 3, 8, 128>}]} {
    %c0 = arith.constant 0 : index
    %c0_0 = arith.constant 0 : index
    %0 = memref.load %arg1[%c0, %c0_0] : memref<2x5xf32, #tpu.memory_space<smem>>
    %c0_1 = arith.constant 0 : index
    %c1 = arith.constant 1 : index
    %1 = memref.load %arg1[%c0_1, %c1] : memref<2x5xf32, #tpu.memory_space<smem>>
    %c0_2 = arith.constant 0 : index
    %c2 = arith.constant 2 : index
    %2 = memref.load %arg1[%c0_2, %c2] : memref<2x5xf32, #tpu.memory_space<smem>>
    %c0_3 = arith.constant 0 : index
    %c3 = arith.constant 3 : index
    %3 = memref.load %arg1[%c0_3, %c3] : memref<2x5xf32, #tpu.memory_space<smem>>
    %c0_4 = arith.constant 0 : index
    %c4 = arith.constant 4 : index
    %4 = memref.load %arg1[%c0_4, %c4] : memref<2x5xf32, #tpu.memory_space<smem>>
    %c1_5 = arith.constant 1 : index
    %c0_6 = arith.constant 0 : index
    %5 = memref.load %arg1[%c1_5, %c0_6] : memref<2x5xf32, #tpu.memory_space<smem>>
    %c1_7 = arith.constant 1 : index
    %c1_8 = arith.constant 1 : index
    %6 = memref.load %arg1[%c1_7, %c1_8] : memref<2x5xf32, #tpu.memory_space<smem>>
    %c1_9 = arith.constant 1 : index
    %c2_10 = arith.constant 2 : index
    %7 = memref.load %arg1[%c1_9, %c2_10] : memref<2x5xf32, #tpu.memory_space<smem>>
    %c1_11 = arith.constant 1 : index
    %c3_12 = arith.constant 3 : index
    %8 = memref.load %arg1[%c1_11, %c3_12] : memref<2x5xf32, #tpu.memory_space<smem>>
    %c1_13 = arith.constant 1 : index
    %c4_14 = arith.constant 4 : index
    %9 = memref.load %arg1[%c1_13, %c4_14] : memref<2x5xf32, #tpu.memory_space<smem>>
    %c0_15 = arith.constant 0 : index
    %10 = memref.load %arg2[%c0_15] : memref<5xf32, #tpu.memory_space<smem>>
    %c1_16 = arith.constant 1 : index
    %11 = memref.load %arg2[%c1_16] : memref<5xf32, #tpu.memory_space<smem>>
    %c2_17 = arith.constant 2 : index
    %12 = memref.load %arg2[%c2_17] : memref<5xf32, #tpu.memory_space<smem>>
    %c3_18 = arith.constant 3 : index
    %13 = memref.load %arg2[%c3_18] : memref<5xf32, #tpu.memory_space<smem>>
    %c4_19 = arith.constant 4 : index
    %14 = memref.load %arg2[%c4_19] : memref<5xf32, #tpu.memory_space<smem>>
    %c0_20 = arith.constant 0 : index
    %c0_21 = arith.constant 0 : index
    %15 = memref.load %arg3[%c0_20, %c0_21] : memref<5x3xf32, #tpu.memory_space<smem>>
    %c0_22 = arith.constant 0 : index
    %c1_23 = arith.constant 1 : index
    %16 = memref.load %arg3[%c0_22, %c1_23] : memref<5x3xf32, #tpu.memory_space<smem>>
    %c0_24 = arith.constant 0 : index
    %c2_25 = arith.constant 2 : index
    %17 = memref.load %arg3[%c0_24, %c2_25] : memref<5x3xf32, #tpu.memory_space<smem>>
    %c1_26 = arith.constant 1 : index
    %c0_27 = arith.constant 0 : index
    %18 = memref.load %arg3[%c1_26, %c0_27] : memref<5x3xf32, #tpu.memory_space<smem>>
    %c1_28 = arith.constant 1 : index
    %c1_29 = arith.constant 1 : index
    %19 = memref.load %arg3[%c1_28, %c1_29] : memref<5x3xf32, #tpu.memory_space<smem>>
    %c1_30 = arith.constant 1 : index
    %c2_31 = arith.constant 2 : index
    %20 = memref.load %arg3[%c1_30, %c2_31] : memref<5x3xf32, #tpu.memory_space<smem>>
    %c2_32 = arith.constant 2 : index
    %c0_33 = arith.constant 0 : index
    %21 = memref.load %arg3[%c2_32, %c0_33] : memref<5x3xf32, #tpu.memory_space<smem>>
    %c2_34 = arith.constant 2 : index
    %c1_35 = arith.constant 1 : index
    %22 = memref.load %arg3[%c2_34, %c1_35] : memref<5x3xf32, #tpu.memory_space<smem>>
    %c2_36 = arith.constant 2 : index
    %c2_37 = arith.constant 2 : index
    %23 = memref.load %arg3[%c2_36, %c2_37] : memref<5x3xf32, #tpu.memory_space<smem>>
    %c3_38 = arith.constant 3 : index
    %c0_39 = arith.constant 0 : index
    %24 = memref.load %arg3[%c3_38, %c0_39] : memref<5x3xf32, #tpu.memory_space<smem>>
    %c3_40 = arith.constant 3 : index
    %c1_41 = arith.constant 1 : index
    %25 = memref.load %arg3[%c3_40, %c1_41] : memref<5x3xf32, #tpu.memory_space<smem>>
    %c3_42 = arith.constant 3 : index
    %c2_43 = arith.constant 2 : index
    %26 = memref.load %arg3[%c3_42, %c2_43] : memref<5x3xf32, #tpu.memory_space<smem>>
    %c4_44 = arith.constant 4 : index
    %c0_45 = arith.constant 0 : index
    %27 = memref.load %arg3[%c4_44, %c0_45] : memref<5x3xf32, #tpu.memory_space<smem>>
    %c4_46 = arith.constant 4 : index
    %c1_47 = arith.constant 1 : index
    %28 = memref.load %arg3[%c4_46, %c1_47] : memref<5x3xf32, #tpu.memory_space<smem>>
    %c4_48 = arith.constant 4 : index
    %c2_49 = arith.constant 2 : index
    %29 = memref.load %arg3[%c4_48, %c2_49] : memref<5x3xf32, #tpu.memory_space<smem>>
    %c0_50 = arith.constant 0 : index
    %30 = memref.load %arg4[%c0_50] : memref<3xf32, #tpu.memory_space<smem>>
    %c1_51 = arith.constant 1 : index
    %31 = memref.load %arg4[%c1_51] : memref<3xf32, #tpu.memory_space<smem>>
    %c2_52 = arith.constant 2 : index
    %32 = memref.load %arg4[%c2_52] : memref<3xf32, #tpu.memory_space<smem>>
    %c0_53 = arith.constant 0 : index
    %c0_54 = arith.constant 0 : index
    %c0_55 = arith.constant 0 : index
    %33 = vector.load %arg5[%c0_53, %c0_54, %c0_55] : memref<2x8x128xf32, #tpu.memory_space<vmem>>, vector<1x8x128xf32>
    %34 = vector.shape_cast %33 : vector<1x8x128xf32> to vector<8x128xf32>
    %c1_56 = arith.constant 1 : index
    %c0_57 = arith.constant 0 : index
    %c0_58 = arith.constant 0 : index
    %35 = vector.load %arg5[%c1_56, %c0_57, %c0_58] : memref<2x8x128xf32, #tpu.memory_space<vmem>>, vector<1x8x128xf32>
    %36 = vector.shape_cast %35 : vector<1x8x128xf32> to vector<8x128xf32>
    %37 = vector.broadcast %0 : f32 to vector<8x128xf32>
    %38 = arith.mulf %34, %37 : vector<8x128xf32>
    %39 = vector.broadcast %5 : f32 to vector<8x128xf32>
    %40 = arith.mulf %36, %39 : vector<8x128xf32>
    %41 = arith.addf %38, %40 : vector<8x128xf32>
    %42 = vector.broadcast %10 : f32 to vector<8x128xf32>
    %43 = arith.addf %41, %42 : vector<8x128xf32>
    %cst = arith.constant 0.000000e+00 : f32
    %44 = vector.broadcast %cst : f32 to vector<8x128xf32>
    %45 = arith.maximumf %43, %44 : vector<8x128xf32>
    %46 = vector.broadcast %1 : f32 to vector<8x128xf32>
    %47 = arith.mulf %34, %46 : vector<8x128xf32>
    %48 = vector.broadcast %6 : f32 to vector<8x128xf32>
    %49 = arith.mulf %36, %48 : vector<8x128xf32>
    %50 = arith.addf %47, %49 : vector<8x128xf32>
    %51 = vector.broadcast %11 : f32 to vector<8x128xf32>
    %52 = arith.addf %50, %51 : vector<8x128xf32>
    %cst_59 = arith.constant 0.000000e+00 : f32
    %53 = vector.broadcast %cst_59 : f32 to vector<8x128xf32>
    %54 = arith.maximumf %52, %53 : vector<8x128xf32>
    %55 = vector.broadcast %2 : f32 to vector<8x128xf32>
    %56 = arith.mulf %34, %55 : vector<8x128xf32>
    %57 = vector.broadcast %7 : f32 to vector<8x128xf32>
    %58 = arith.mulf %36, %57 : vector<8x128xf32>
    %59 = arith.addf %56, %58 : vector<8x128xf32>
    %60 = vector.broadcast %12 : f32 to vector<8x128xf32>
    %61 = arith.addf %59, %60 : vector<8x128xf32>
    %cst_60 = arith.constant 0.000000e+00 : f32
    %62 = vector.broadcast %cst_60 : f32 to vector<8x128xf32>
    %63 = arith.maximumf %61, %62 : vector<8x128xf32>
    %64 = vector.broadcast %3 : f32 to vector<8x128xf32>
    %65 = arith.mulf %34, %64 : vector<8x128xf32>
    %66 = vector.broadcast %8 : f32 to vector<8x128xf32>
    %67 = arith.mulf %36, %66 : vector<8x128xf32>
    %68 = arith.addf %65, %67 : vector<8x128xf32>
    %69 = vector.broadcast %13 : f32 to vector<8x128xf32>
    %70 = arith.addf %68, %69 : vector<8x128xf32>
    %cst_61 = arith.constant 0.000000e+00 : f32
    %71 = vector.broadcast %cst_61 : f32 to vector<8x128xf32>
    %72 = arith.maximumf %70, %71 : vector<8x128xf32>
    %73 = vector.broadcast %4 : f32 to vector<8x128xf32>
    %74 = arith.mulf %34, %73 : vector<8x128xf32>
    %75 = vector.broadcast %9 : f32 to vector<8x128xf32>
    %76 = arith.mulf %36, %75 : vector<8x128xf32>
    %77 = arith.addf %74, %76 : vector<8x128xf32>
    %78 = vector.broadcast %14 : f32 to vector<8x128xf32>
    %79 = arith.addf %77, %78 : vector<8x128xf32>
    %cst_62 = arith.constant 0.000000e+00 : f32
    %80 = vector.broadcast %cst_62 : f32 to vector<8x128xf32>
    %81 = arith.maximumf %79, %80 : vector<8x128xf32>
    %82 = vector.broadcast %15 : f32 to vector<8x128xf32>
    %83 = arith.mulf %45, %82 : vector<8x128xf32>
    %84 = vector.broadcast %18 : f32 to vector<8x128xf32>
    %85 = arith.mulf %54, %84 : vector<8x128xf32>
    %86 = arith.addf %83, %85 : vector<8x128xf32>
    %87 = vector.broadcast %21 : f32 to vector<8x128xf32>
    %88 = arith.mulf %63, %87 : vector<8x128xf32>
    %89 = arith.addf %86, %88 : vector<8x128xf32>
    %90 = vector.broadcast %24 : f32 to vector<8x128xf32>
    %91 = arith.mulf %72, %90 : vector<8x128xf32>
    %92 = arith.addf %89, %91 : vector<8x128xf32>
    %93 = vector.broadcast %27 : f32 to vector<8x128xf32>
    %94 = arith.mulf %81, %93 : vector<8x128xf32>
    %95 = arith.addf %92, %94 : vector<8x128xf32>
    %96 = vector.broadcast %30 : f32 to vector<8x128xf32>
    %97 = arith.addf %95, %96 : vector<8x128xf32>
    %cst_63 = arith.constant 0.000000e+00 : f32
    %98 = vector.broadcast %cst_63 : f32 to vector<8x128xf32>
    %99 = arith.maximumf %97, %98 : vector<8x128xf32>
    %c0_64 = arith.constant 0 : index
    %c0_65 = arith.constant 0 : index
    %c0_66 = arith.constant 0 : index
    %100 = vector.load %arg6[%c0_64, %c0_65, %c0_66] : memref<3x8x128xf32, #tpu.memory_space<vmem>>, vector<1x8x128xf32>
    %101 = vector.shape_cast %100 : vector<1x8x128xf32> to vector<8x128xf32>
    %102 = vector.shape_cast %99 : vector<8x128xf32> to vector<1x8x128xf32>
    tpu.vector_store %arg6[%c0_64, %c0_65, %c0_66], %102 {strides = array<i32>} : memref<3x8x128xf32, #tpu.memory_space<vmem>>, vector<1x8x128xf32>,
    %103 = vector.broadcast %16 : f32 to vector<8x128xf32>
    %104 = arith.mulf %45, %103 : vector<8x128xf32>
    %105 = vector.broadcast %19 : f32 to vector<8x128xf32>
    %106 = arith.mulf %54, %105 : vector<8x128xf32>
    %107 = arith.addf %104, %106 : vector<8x128xf32>
    %108 = vector.broadcast %22 : f32 to vector<8x128xf32>
    %109 = arith.mulf %63, %108 : vector<8x128xf32>
    %110 = arith.addf %107, %109 : vector<8x128xf32>
    %111 = vector.broadcast %25 : f32 to vector<8x128xf32>
    %112 = arith.mulf %72, %111 : vector<8x128xf32>
    %113 = arith.addf %110, %112 : vector<8x128xf32>
    %114 = vector.broadcast %28 : f32 to vector<8x128xf32>
    %115 = arith.mulf %81, %114 : vector<8x128xf32>
    %116 = arith.addf %113, %115 : vector<8x128xf32>
    %117 = vector.broadcast %31 : f32 to vector<8x128xf32>
    %118 = arith.addf %116, %117 : vector<8x128xf32>
    %cst_67 = arith.constant 0.000000e+00 : f32
    %119 = vector.broadcast %cst_67 : f32 to vector<8x128xf32>
    %120 = arith.maximumf %118, %119 : vector<8x128xf32>
    %c1_68 = arith.constant 1 : index
    %c0_69 = arith.constant 0 : index
    %c0_70 = arith.constant 0 : index
    %121 = vector.load %arg6[%c1_68, %c0_69, %c0_70] : memref<3x8x128xf32, #tpu.memory_space<vmem>>, vector<1x8x128xf32>
    %122 = vector.shape_cast %121 : vector<1x8x128xf32> to vector<8x128xf32>
    %123 = vector.shape_cast %120 : vector<8x128xf32> to vector<1x8x128xf32>
    tpu.vector_store %arg6[%c1_68, %c0_69, %c0_70], %123 {strides = array<i32>} : memref<3x8x128xf32, #tpu.memory_space<vmem>>, vector<1x8x128xf32>,
    %124 = vector.broadcast %17 : f32 to vector<8x128xf32>
    %125 = arith.mulf %45, %124 : vector<8x128xf32>
    %126 = vector.broadcast %20 : f32 to vector<8x128xf32>
    %127 = arith.mulf %54, %126 : vector<8x128xf32>
    %128 = arith.addf %125, %127 : vector<8x128xf32>
    %129 = vector.broadcast %23 : f32 to vector<8x128xf32>
    %130 = arith.mulf %63, %129 : vector<8x128xf32>
    %131 = arith.addf %128, %130 : vector<8x128xf32>
    %132 = vector.broadcast %26 : f32 to vector<8x128xf32>
    %133 = arith.mulf %72, %132 : vector<8x128xf32>
    %134 = arith.addf %131, %133 : vector<8x128xf32>
    %135 = vector.broadcast %29 : f32 to vector<8x128xf32>
    %136 = arith.mulf %81, %135 : vector<8x128xf32>
    %137 = arith.addf %134, %136 : vector<8x128xf32>
    %138 = vector.broadcast %32 : f32 to vector<8x128xf32>
    %139 = arith.addf %137, %138 : vector<8x128xf32>
    %cst_71 = arith.constant 0.000000e+00 : f32
    %140 = vector.broadcast %cst_71 : f32 to vector<8x128xf32>
    %141 = arith.maximumf %139, %140 : vector<8x128xf32>
    %c2_72 = arith.constant 2 : index
    %c0_73 = arith.constant 0 : index
    %c0_74 = arith.constant 0 : index
    %142 = vector.load %arg6[%c2_72, %c0_73, %c0_74] : memref<3x8x128xf32, #tpu.memory_space<vmem>>, vector<1x8x128xf32>
    %143 = vector.shape_cast %142 : vector<1x8x128xf32> to vector<8x128xf32>
    %144 = vector.shape_cast %141 : vector<8x128xf32> to vector<1x8x128xf32>
    tpu.vector_store %arg6[%c2_72, %c0_73, %c0_74], %144 {strides = array<i32>} : memref<3x8x128xf32, #tpu.memory_space<vmem>>, vector<1x8x128xf32>,
    return
  }
  func.func @transform_0(%arg0: i32) -> (i32, i32) {
    %c0_i32 = arith.constant 0 : i32
    %c0_i32_0 = arith.constant 0 : i32
    %c0_i32_1 = arith.constant 0 : i32
    return %c0_i32, %c0_i32_0 : i32, i32
  }
  func.func @transform_1(%arg0: i32) -> i32 {
    %c0_i32 = arith.constant 0 : i32
    %c0_i32_0 = arith.constant 0 : i32
    return %c0_i32 : i32
  }
  func.func @transform_2(%arg0: i32) -> (i32, i32) {
    %c0_i32 = arith.constant 0 : i32
    %c0_i32_0 = arith.constant 0 : i32
    %c0_i32_1 = arith.constant 0 : i32
    return %c0_i32, %c0_i32_0 : i32, i32
  }
  func.func @transform_3(%arg0: i32) -> i32 {
    %c0_i32 = arith.constant 0 : i32
    %c0_i32_0 = arith.constant 0 : i32
    return %c0_i32 : i32
  }
  func.func @transform_4(%arg0: i32) -> (i32, i32, i32) {
    %c0_i32 = arith.constant 0 : i32
    %c0_i32_0 = arith.constant 0 : i32
    %c0_i32_1 = arith.constant 0 : i32
    return %c0_i32, %arg0, %c0_i32_0 : i32, i32, i32
  }
  func.func @transform_5(%arg0: i32) -> (i32, i32, i32) {
    %c0_i32 = arith.constant 0 : i32
    %c0_i32_0 = arith.constant 0 : i32
    %c0_i32_1 = arith.constant 0 : i32
    return %c0_i32, %arg0, %c0_i32_0 : i32, i32, i32
  }
}

</mosaic_0001>

<bundles_post_ra>
// kernel: tpu_custom_call.1
= control target key start
LH: loop header
LB: loop body
LE: loop exit
PB: predicated region body
PF: predicated region fallthrough
CT: control target
= control target key end

     0   :  { %10 = vsyncpa [#allocation4], 0  ;;  %s477_s0 = inlined_call_operand.vmem [shape: f32[2,5], index: 0, kind: input, shape index: {}]   ;;  %s478_s1 = inlined_call_operand.vmem [shape: f32[5], index: 1, kind: input, shape index: {}]   ;;  %s479_s2 = inlined_call_operand.vmem [shape: f32[5,3], index: 2, kind: input, shape index: {}]   ;;  %s480_s3 = inlined_call_operand.vmem [shape: f32[3], index: 3, kind: input, shape index: {}]   ;;  %s481_s4 = inlined_call_operand.vmem [shape: f32[2,8,128], index: 4, kind: input, shape index: {}]   ;;  %s482_s5 = inlined_call_operand.hbm [shape: f32[3,8,128], index: 5, kind: output, shape index: {}]  }
   0x1   :  { %11 = vsyncpa [#allocation6], 0 }
   0x2   :  { %12 = vsyncpa [#allocation9], 0  ;;  %s30_s20 = sshll.u32 %s478_s1, 4  ;;  %s31_s20 = int_to_ptr.vmem [resolvable:$true] %s30_s20 }
   0x3   :  { %13 = vsyncpa [#allocation3], 0  ;;  %s20_s23 = sshll.u32 %s477_s0, 4  ;;  %s257_s24 = scalar_lea.vmem %s31_s20, 16  ;;  %s21_s23 = int_to_ptr.vmem [resolvable:$true] %s20_s23 }
   0x4   :  { %p258_p0 = scmp.ne.s32.totalorder %s31_s20, %s257_s24  ;;  %p262_p1 = scmp.lt.s32.totalorder %s31_s20, %s31_s20 }
   0x5   :  { %p263_p2 = scmp.lt.s32.totalorder %s257_s24, %s257_s24 }
   0x7   :  { %p264_p3 = por %p263_p2, %p262_p1 }
   0x9   :  { %p265_p4 = pnand %p264_p3, %p258_p0 }
   0xb   :  { %268 = shalt.err (!%p265_p4)
}
   0xc   :  { %s335_s25 = smov [#allocation5]   ;;  %s269_s26 = scalar_lea.vmem %s21_s23, 32 }
   0xd   :  { %33 = dma.vmem_to_smem %s31_s20, 16, %s335_s25, [#allocation6]  }
   0xe   :  { %p270_p5 = scmp.ne.s32.totalorder %s21_s23, %s269_s26  ;;  %p274_p6 = scmp.lt.s32.totalorder %s21_s23, %s21_s23 }
   0xf   :  { %p275_p7 = scmp.lt.s32.totalorder %s269_s26, %s269_s26 }
  0x11   :  { %p276_p8 = por %p275_p7, %p274_p6 }
  0x13   :  { %p277_p9 = pnand %p276_p8, %p270_p5 }
  0x15   :  { %280 = shalt.err (!%p277_p9)
}
  0x16   :  { %s336_s1 = smov [#allocation2]   ;;  %s40_s28 = sshll.u32 %s479_s2, 4  ;;  %s41_s28 = int_to_ptr.vmem [resolvable:$true] %s40_s28 }
  0x17   :  { %23 = dma.vmem_to_smem %s21_s23, 32, %s336_s1, [#allocation4]  }
  0x18   :  { %s50_s6 = sshll.u32 %s480_s3, 4  ;;  %s281_s7 = scalar_lea.vmem %s41_s28, 128  ;;  %s51_s6 = int_to_ptr.vmem [resolvable:$true] %s50_s6 }
  0x19   :  { %p282_p10 = scmp.ne.s32.totalorder %s41_s28, %s281_s7  ;;  %p286_p11 = scmp.lt.s32.totalorder %s41_s28, %s41_s28 }
  0x1a   :  { %p287_p12 = scmp.lt.s32.totalorder %s281_s7, %s281_s7 }
  0x1c   :  { %p288_p13 = por %p287_p12, %p286_p11 }
  0x1e   :  { %p289_p0 = pnand %p288_p13, %p282_p10 }
  0x20   :  { %292 = shalt.err (!%p289_p0)
}
  0x21   :  { %s337_s8 = smov [#allocation7]   ;;  %s293_s9 = scalar_lea.vmem %s51_s6, 16 }
  0x22   :  { %43 = dma.vmem_to_smem %s41_s28, 128, %s337_s8, [#allocation6]  }
  0x23   :  { %p294_p1 = scmp.ne.s32.totalorder %s51_s6, %s293_s9  ;;  %p298_p2 = scmp.lt.s32.totalorder %s51_s6, %s51_s6 }
  0x24   :  { %p299_p3 = scmp.lt.s32.totalorder %s293_s9, %s293_s9 }
  0x26   :  { %p300_p4 = por %p299_p3, %p298_p2 }
  0x28   :  { %p301_p5 = pnand %p300_p4, %p294_p1 }
  0x2a   :  { %304 = shalt.err (!%p301_p5)
}
  0x2b   :  { %s338_s2 = smov [#allocation8]  }
  0x2c   :  { %53 = dma.vmem_to_smem %s51_s6, 16, %s338_s2, [#allocation9]  }
  0x2d   :  { %327 = dma.done.wait [#allocation4], 32  }
  0x2e   :  { %328 = vsyncadd [#allocation4], 4294967264 }
  0x2f   :  { %329 = dma.done.wait [#allocation6], 144  }
  0x30   :  { %330 = vsyncadd [#allocation6], 4294967152 }
  0x31   :  { %331 = dma.done.wait [#allocation9], 16  }
  0x32   :  { %332 = vsyncadd [#allocation9], 4294967280 }
  0x33   :  { %68 = sfence }
  0x34   :  { %s69_s3 = sld [smem:[#allocation2]]  ;;  %s220_s10 = sld [smem:[#allocation2 + $0x1]]  ;;  %v102_v0 = vld [vmem:[%s481_s4] sm:$0xff]  ;;  %v249_v1 = vld [vmem:[%s481_s4 + $0x8] sm:$0xff] }
  0x35   :  { %s221_s11 = sld [smem:[#allocation2 + $0x2]]  ;;  %s222_s12 = sld [smem:[#allocation2 + $0x3]] }
  0x36   :  { %s384_s13 = sld [smem:[#allocation2 + $0x4]]  ;;  %s224_s14 = sld [smem:[#allocation2 + $0x80]] }
  0x37   :  { %s225_s15 = sld [smem:[#allocation2 + $0x81]]  ;;  %s226_s16 = sld [smem:[#allocation2 + $0x82]] }
  0x38   :  { %s386_s17 = sld [smem:[#allocation2 + $0x83]]  ;;  %s388_s18 = sld [smem:[#allocation2 + $0x84]] }
  0x39   :  { %s393_s21 = sld [smem:[#allocation5]]  ;;  %s395_s22 = sld [smem:[#allocation5 + $0x1]] }
  0x3a   :  { %s397_s23 = sld [smem:[#allocation5 + $0x2]]  ;;  %s399_s24 = sld [smem:[#allocation5 + $0x3]]  ;;  %v105_v2 = vstv %s69_s3  ;;  %v113_v3 = vstv %s220_s10 }
  0x3b   :  { %s404_s1 = sld [smem:[#allocation5 + $0x4]]  ;;  %s406_s0 = sld [smem:[#allocation7]]  ;;  %v106_v4 = vmul.f32 %v105_v2, %v102_v0  ;;  %v114_v5 = vmul.f32 %v113_v3, %v102_v0  ;;  %v121_v6 = vstv %s221_s11  ;;  %v129_v7 = vstv %s222_s12 }
  0x3c   :  { %s408_s27 = sld [smem:[#allocation7 + $0x80]]  ;;  %v107_v8 = vstv %s224_s14  ;;  %v122_v9 = vmul.f32 %v121_v6, %v102_v0  ;;  %v130_v10 = vmul.f32 %v129_v7, %v102_v0  ;;  %v137_v11 = vstv %s384_s13  ;;  %s419_s30 = sld [smem:[#allocation7 + $0x1]] }
  0x3d   :  { %s410_s28 = sld [smem:[#allocation7 + $0x100]]  ;;  %v108_v12 = vmul.f32 %v249_v1, %v107_v8  ;;  %v115_v13 = vstv %s225_s15  ;;  %v123_v14 = vstv %s226_s16  ;;  %v138_v15 = vmul.f32 %v137_v11, %v102_v0  ;;  %s423_s6 = sld [smem:[#allocation7 + $0x81]] }
  0x3e   :  { %s413_s4 = sld [smem:[#allocation7 + $0x180]]  ;;  %v116_v16 = vmul.f32 %v249_v1, %v115_v13  ;;  %v124_v17 = vmul.f32 %v249_v1, %v123_v14  ;;  %v131_v18 = vstv %s386_s17  ;;  %v139_v19 = vstv %s388_s18  ;;  %s425_s7 = sld [smem:[#allocation7 + $0x101]] }
  0x3f   :  { %s415_s29 = sld [smem:[#allocation7 + $0x200]]  ;;  %v109_v20 = vadd.f32 %v108_v12, %v106_v4  ;;  %v110_v21 = vstv %s393_s21  ;;  %v118_v22 = vstv %s395_s22  ;;  %v132_v23 = vmul.f32 %v249_v1, %v131_v18  ;;  %s429_s8 = sld [smem:[#allocation7 + $0x181]] }
  0x40   :  { %v117_v24 = vadd.f32 %v116_v16, %v114_v5  ;;  %v125_v25 = vadd.f32 %v124_v17, %v122_v9  ;;  %v126_v26 = vstv %s397_s23  ;;  %v134_v27 = vstv %s399_s24  ;;  %s431_s9 = sld [smem:[#allocation7 + $0x201]]  ;;  %s436_s2 = sld [smem:[#allocation7 + $0x2]] }
  0x41   :  { %v111_v28 = vadd.f32 %v110_v21, %v109_v20  ;;  %v133_v29 = vadd.f32 %v132_v23, %v130_v10  ;;  %v140_v30 = vmul.f32 %v249_v1, %v139_v19  ;;  %v142_v31 = vstv %s404_s1  ;;  %s439_s3 = sld [smem:[#allocation7 + $0x82]]  ;;  %s446_s12 = sld [smem:[#allocation8]] }
  0x42   :  { %v119_v32 = vadd.f32 %v118_v22, %v117_v24  ;;  %v127_v33 = vadd.f32 %v126_v26, %v125_v25  ;;  %v145_v34 = vstv %s406_s0  ;;  %v147_v35 = vstv %s408_s27  ;;  %s441_s10 = sld [smem:[#allocation7 + $0x102]]  ;;  %s451_s14 = sld [smem:[#allocation8 + $0x1]] }
  0x43   :  { %v112_v36 = vmax.f32 %v111_v28, 0.0  ;;  %v135_v37 = vadd.f32 %v134_v27, %v133_v29  ;;  %v141_v38 = vadd.f32 %v140_v30, %v138_v15  ;;  %v150_v39 = vstv %s410_s28  ;;  %s444_s11 = sld [smem:[#allocation7 + $0x182]]  ;;  %s339_s16 = smov [#allocation10]  }
  0x44   :  { %v120_v40 = vmax.f32 %v119_v32, 0.0  ;;  %v128_v41 = vmax.f32 %v127_v33, 0.0  ;;  %v153_v42 = vstv %s413_s4  ;;  %s449_s13 = sld [smem:[#allocation7 + $0x202]]  ;;  %v163_v49 = vstv %s419_s30  ;;  %s206_s17 = sshll.u32 %s339_s16, 4  ;;  %s207_s17 = int_to_ptr.vmem [resolvable:$true] %s206_s17 }
  0x45   :  { %v136_v43 = vmax.f32 %v135_v37, 0.0  ;;  %v143_v44 = vadd.f32 %v142_v31, %v141_v38  ;;  %v146_v45 = vmul.f32 %v145_v34, %v112_v36  ;;  %v156_v46 = vstv %s415_s29  ;;  %s248_s15 = sld [smem:[#allocation8 + $0x2]]  ;;  %s305_s18 = scalar_lea.vmem %s207_s17, 384 }
  0x46   :  { %v148_v47 = vmul.f32 %v147_v35, %v120_v40  ;;  %v151_v48 = vmul.f32 %v150_v39, %v128_v41  ;;  %v165_v50 = vstv %s423_s6  ;;  %v164_v53 = vmul.f32 %v163_v49, %v112_v36  ;;  %p306_p6 = scmp.ne.s32.totalorder %s207_s17, %s305_s18  ;;  %p310_p7 = scmp.lt.s32.totalorder %s207_s17, %s207_s17 }
  0x47   :  { %v144_v51 = vmax.f32 %v143_v44, 0.0  ;;  %v154_v52 = vmul.f32 %v153_v42, %v136_v43  ;;  %v166_v54 = vmul.f32 %v165_v50, %v120_v40  ;;  %v168_v56 = vstv %s425_s7  ;;  %p311_p8 = scmp.lt.s32.totalorder %s305_s18, %s305_s18 }
  0x48   :  { %v149_v55 = vadd.f32 %v148_v47, %v146_v45  ;;  %v171_v57 = vstv %s429_s8  ;;  %v174_v58 = vstv %s431_s9  ;;  %v169_v60 = vmul.f32 %v168_v56, %v128_v41 }
  0x49   :  { %v167_v59 = vadd.f32 %v166_v54, %v164_v53  ;;  %v172_v61 = vmul.f32 %v171_v57, %v136_v43  ;;  %v157_v63 = vmul.f32 %v156_v46, %v144_v51  ;;  %v175_v0 = vmul.f32 %v174_v58, %v144_v51  ;;  %p312_p9 = por %p311_p8, %p310_p7 }
  0x4a   :  { %v152_v62 = vadd.f32 %v151_v48, %v149_v55  ;;  %v182_v1 = vstv %s436_s2  ;;  %v184_v4 = vstv %s439_s3  ;;  %v187_v5 = vstv %s441_s10 }
  0x4b   :  { %v170_v2 = vadd.f32 %v169_v60, %v167_v59  ;;  %v183_v3 = vmul.f32 %v182_v1, %v112_v36  ;;  %v185_v7 = vmul.f32 %v184_v4, %v120_v40  ;;  %v188_v8 = vmul.f32 %v187_v5, %v128_v41  ;;  %p313_p10 = pnand %p312_p9, %p306_p6 }
  0x4c   :  { %v155_v6 = vadd.f32 %v154_v52, %v152_v62  ;;  %v190_v9 = vstv %s444_s11  ;;  %v159_v10 = vstv %s446_s12  ;;  %v193_v12 = vstv %s449_s13 }
  0x4d   :  { %v173_v11 = vadd.f32 %v172_v61, %v170_v2  ;;  %v177_v14 = vstv %s451_s14  ;;  %v186_v15 = vadd.f32 %v185_v7, %v183_v3  ;;  %v191_v16 = vmul.f32 %v190_v9, %v136_v43 }
  0x4e   :  { %v158_v13 = vadd.f32 %v157_v63, %v155_v6  ;;  %v194_v20 = vmul.f32 %v193_v12, %v144_v51  ;;  %v196_v25 = vstv %s248_s15 }
  0x4f   :  { %v176_v17 = vadd.f32 %v175_v0, %v173_v11  ;;  %v189_v19 = vadd.f32 %v188_v8, %v186_v15 }
  0x50   :  { %v160_v18 = vadd.f32 %v159_v10, %v158_v13 }
  0x51   :  { %v178_v21 = vadd.f32 %v177_v14, %v176_v17  ;;  %v192_v23 = vadd.f32 %v191_v16, %v189_v19 }
  0x52   :  { %v161_v22 = vmax.f32 %v160_v18, 0.0 }
  0x53   :  { %v179_v24 = vmax.f32 %v178_v21, 0.0  ;;  %v195_v26 = vadd.f32 %v194_v20, %v192_v23 }
  0x54   :  { %162 = vst [vmem:[#allocation10] sm:$0xff] %v161_v22 }
  0x55   :  { %181 = vst [vmem:[#allocation10 + $0x8] sm:$0xff] %v179_v24  ;;  %v197_v27 = vadd.f32 %v196_v25, %v195_v26 }
  0x57   :  { %v198_v28 = vmax.f32 %v197_v27, 0.0 }
  0x59   :  { %200 = vst [vmem:[#allocation10 + $0x10] sm:$0xff] %v198_v28 }
  0x5a   :  { %316 = shalt.err (!%p313_p10)
}
  0x5b   :  { %s317_s21 = scalar_lea.hbm %s482_s5, 384 }
  0x5c   :  { %p318_p11 = scmp.ne.s32.totalorder %s482_s5, %s317_s21  ;;  %p321_p12 = scmp.lt.u32.totalorder %s317_s21, %s482_s5 }
  0x5e   :  { %p323_p13 = pnand %p321_p12, %p318_p11 }
  0x60   :  { %326 = shalt.err (!%p323_p13)
}
  0x61   :  { %s340_s26 = smov 128   ;;  %s341_s1 = smov 8  }
  0x62   :  { %212 = dma.vmem_to_hbm [thread:$0]  %s207_s17, 384, %s482_s5, [#allocation3], %s340_s26, %s340_s26, %s341_s1  }
  0x63   :  { %333 = dma.done.wait [#allocation3], 384  }
  0x64   :  { %334 = vsyncadd [#allocation3], 4294966912 }
  0x65   :  { %216 = vsyncpa [#allocation3], 1 }
  0x66   :  { %217 = vsyncpa [#allocation4], 1 }
  0x67   :  { %218 = vsyncpa [#allocation6], 1 }
  0x68   :  { %219 = vsyncpa [#allocation9], 1 }

</bundles_post_ra>
